<compile_context>
chip_gen: v6e
topology: v6e:2x2x1
jax: 0.10.0
libtpu: 0.0.40
codegen_flags: <defaults>
</compile_context>

<pallas_src>
import jax
import jax.numpy as jnp
from jax.experimental import pallas as pl
from jax.experimental.pallas import tpu as pltpu


def _round_up(x, m):
    return (x + m - 1) // m * m


def _choose_block_b(B, T, D, c_pad, pipelined_budget_bytes):
    """Pick a batch tile so the double-buffered stream + in-kernel f32
    intermediates fit under the VMEM budget."""
    # per batch row:
    #   double-buffered streams: bf16 emb row + bf16 cat row + f32 out row
    #   single-instance f32 intermediates: promoted emb + two (T,D) products
    per_row = (2 * (T * D * 2 + D * 2 + c_pad * 4)   # pipelined bf16/f32 buffers
               + 3 * T * D * 4)                      # in-kernel f32 temporaries
    tb = max(8, (pipelined_budget_bytes // max(per_row, 1)) // 8 * 8)
    return min(tb, _round_up(B, 8))


def fasttext_attention_kernel(emb_ref, cat_ref, attw_ref, fcw_ref, fcb_ref, out_ref):
    emb = emb_ref[...].astype(jnp.float32)              # (TB, T, D)  bf16 -> f32
    aw = attw_ref[...].astype(jnp.float32)               # (1, D)

    # attention logits: emb @ attention_weights (D, 1) -> (TB, T)
    # (VPU multiply + lane reduce; T and D are too small to be worth the MXU)
    s = jnp.sum(emb * aw[None, :, :], axis=-1)

    # numerically stable softmax over tokens; reciprocal on the EUP, with the
    # normalization folded into a cheap (TB, D) post-scale instead of a
    # (TB, T, D) broadcast multiply by the normalized probabilities.
    s = s - jnp.max(s, axis=1, keepdims=True)
    e = jnp.exp(s)                                                         # (TB, T)
    inv_denom = pl.reciprocal(jnp.sum(e, axis=1, keepdims=True), approx=True)  # (TB, 1)

    weighted = jnp.sum(emb * e[:, :, None], axis=1) * inv_denom            # (TB, D)

    x_in = weighted + cat_ref[...].astype(jnp.float32)                     # (TB, D)

    # final linear layer on the MXU (lane-dense, padded C)
    z = jnp.dot(x_in, fcw_ref[...], preferred_element_type=jnp.float32)
    out_ref[...] = z + fcb_ref[...]                                        # (TB, C_pad)


def fasttext_attention_forward(text_emb, cat_sum, att_w, fc_w_t, fc_b,
                               *, pipelined_budget_bytes=10 * 1024 * 1024,
                               vmem_limit_bytes=32 * 1024 * 1024):
    """text_emb: (B,T,D) bf16, cat_sum: (B,D) bf16, att_w: (1,D) f32,
    fc_w_t: (D,C) f32, fc_b: (1,C) f32  ->  logits (B,C) f32."""
    B, T, D = text_emb.shape
    C = fc_w_t.shape[1]

    # Lane-dense output: pad num_classes up to a multiple of 128 (zeros sliced off).
    c_pad = _round_up(C, 128)
    if c_pad != C:
        fc_w_t = jnp.pad(fc_w_t, ((0, 0), (0, c_pad - C)))
        fc_b = jnp.pad(fc_b, ((0, 0), (0, c_pad - C)))

    # Batch tile sized for a 2-deep pipeline under the VMEM budget.
    # Budget is conservative so it also fits the 64 MiB/TC v7x; on v5e/v6e
    # (128 MiB) it can be raised for larger T*D products.
    tb = _choose_block_b(B, T, D, c_pad, pipelined_budget_bytes)
    b_pad = _round_up(B, tb)
    if b_pad != B:
        text_emb = jnp.pad(text_emb, ((0, b_pad - B), (0, 0), (0, 0)))
        cat_sum = jnp.pad(cat_sum, ((0, b_pad - B), (0, 0)))

    grid = (b_pad // tb,)
    emb_bytes = text_emb.dtype.itemsize
    cost = pl.CostEstimate(
        flops=2 * b_pad * (2 * T * D + D * c_pad),
        transcendentals=b_pad * T,
        bytes_accessed=(b_pad * T * D * emb_bytes + b_pad * D * emb_bytes
                        + D * c_pad * 4 + c_pad * 4 + D * 4
                        + b_pad * c_pad * 4),
    )

    out = pl.pallas_call(
        fasttext_attention_kernel,
        out_shape=jax.ShapeDtypeStruct((b_pad, c_pad), jnp.float32),
        grid=grid,
        in_specs=[
            pl.BlockSpec((tb, T, D), lambda i: (i, 0, 0)),   # streamed emb tile (bf16)
            pl.BlockSpec((tb, D), lambda i: (i, 0)),         # streamed cat tile (bf16)
            pl.BlockSpec((1, D), lambda i: (0, 0)),          # resident attention weights
            pl.BlockSpec((D, c_pad), lambda i: (0, 0)),      # resident fc weight (transposed)
            pl.BlockSpec((1, c_pad), lambda i: (0, 0)),      # resident fc bias
        ],
        out_specs=pl.BlockSpec((tb, c_pad), lambda i: (i, 0)),
        compiler_params=pltpu.CompilerParams(
            dimension_semantics=("parallel",),
            vmem_limit_bytes=vmem_limit_bytes,
        ),
        cost_estimate=cost,
    )(text_emb, cat_sum, att_w, fc_w_t, fc_b)

    return out[:B, :C]


def reference_forward(text_emb, cat_sum, att_w, fc_w_t, fc_b):
    emb = text_emb.astype(jnp.float32)
    s = jnp.einsum("btd,d->bt", emb, att_w[0].astype(jnp.float32))
    p = jax.nn.softmax(s, axis=1)
    weighted = jnp.sum(emb * p[:, :, None], axis=1)
    x_in = weighted + cat_sum.astype(jnp.float32)
    return x_in @ fc_w_t + fc_b


if __name__ == "__main__":
    # Small, deterministic configuration.
    B = 2            # batch
    T = 8            # sequence length (tokens)
    D = 32           # embedding_dim
    vocab_size = 50
    num_classes = 16
    cat_vocab_sizes = [5, 7]   # categorical_vocabulary_sizes
    padding_idx = 0

    key = jax.random.PRNGKey(0)
    keys = jax.random.split(key, 8)

    # Parameters (deterministic synthetic init, mimicking nn.Embedding / nn.Linear shapes).
    # Embedding tables stored in bf16 so the dominant (B,T,D) stream is half-width.
    text_table = jax.random.normal(keys[0], (vocab_size, D), jnp.float32)
    text_table = text_table.at[padding_idx].set(0.0)           # padding_idx row is zero
    text_table = text_table.astype(jnp.bfloat16)

    cat_tables = [
        jax.random.normal(keys[1 + i], (v, D), jnp.float32).astype(jnp.bfloat16)
        for i, v in enumerate(cat_vocab_sizes)
    ]

    att_w = jax.random.normal(keys[4], (1, D), jnp.float32)                     # (D,1) stored as (1,D)
    fc_w_t = jax.random.normal(keys[5], (D, num_classes), jnp.float32) * 0.1    # fc.weight.T
    fc_b = jax.random.normal(keys[6], (1, num_classes), jnp.float32) * 0.1      # fc.bias

    # Inputs.
    encoded_text = jax.random.randint(keys[7], (B, T), 0, vocab_size, jnp.int32)
    additional_inputs = jnp.stack([
        jax.random.randint(jax.random.PRNGKey(100 + i), (B,), 0, v, jnp.int32)
        for i, v in enumerate(cat_vocab_sizes)
    ])  # (n_cat, B)

    # Glue: embedding lookups (gather) in plain JAX.
    # TODO(synk): table gathers stay outside the kernel (data-dependent HBM gather).
    text_emb = jnp.take(text_table, encoded_text, axis=0)          # (B, T, D) bf16
    cat_sum_f32 = jnp.zeros((B, D), jnp.float32)
    for i in range(len(cat_vocab_sizes)):
        cat_sum_f32 = cat_sum_f32 + jnp.take(
            cat_tables[i], additional_inputs[i], axis=0).astype(jnp.float32)
    cat_sum = cat_sum_f32.astype(jnp.bfloat16)                     # (B, D) bf16

    out = fasttext_attention_forward(text_emb, cat_sum, att_w, fc_w_t, fc_b)
    out = jax.block_until_ready(out)

    ref = reference_forward(text_emb, cat_sum, att_w, fc_w_t, fc_b)
    assert out.shape == (B, num_classes)
    assert jnp.allclose(out, ref, atol=2e-3, rtol=2e-3), "mismatch vs reference"

    print("KERNEL_OK")
</pallas_src>

<mosaic_0001>
module attributes {stable_mosaic.version = 11 : i64} {
  func.func @fasttext_attention_kernel(%arg0: i32, %arg1: memref<8x8x32xbf16, #tpu.memory_space<vmem>>, %arg2: memref<8x32xbf16, #tpu.memory_space<vmem>>, %arg3: memref<1x32xf32, #tpu.memory_space<vmem>>, %arg4: memref<32x128xf32, #tpu.memory_space<vmem>>, %arg5: memref<1x128xf32, #tpu.memory_space<vmem>>, %arg6: memref<8x128xf32, #tpu.memory_space<vmem>>) attributes {dimension_semantics = [#tpu.dimension_semantics<parallel>], iteration_bounds = array<i64: 1>, scalar_prefetch = 0 : i64, scratch_operands = 0 : i64, tpu.core_type = #tpu.core_type<tc>, window_params = [{transform_indices = @transform_0, window_bounds = array<i64: 8, 8, 32>}, {transform_indices = @transform_1, window_bounds = array<i64: 8, 32>}, {pipeline_mode = #tpu.pipeline_mode<synchronous>, transform_indices = @transform_2, window_bounds = array<i64: 1, 32>}, {pipeline_mode = #tpu.pipeline_mode<synchronous>, transform_indices = @transform_3, window_bounds = array<i64: 32, 128>}, {pipeline_mode = #tpu.pipeline_mode<synchronous>, transform_indices = @transform_4, window_bounds = array<i64: 1, 128>}, {transform_indices = @transform_5, window_bounds = array<i64: 8, 128>}]} {
    %c0 = arith.constant 0 : index
    %c0_0 = arith.constant 0 : index
    %c0_1 = arith.constant 0 : index
    %0 = vector.load %arg1[%c0, %c0_0, %c0_1] : memref<8x8x32xbf16, #tpu.memory_space<vmem>>, vector<8x8x32xbf16>
    %1 = arith.extf %0 : vector<8x8x32xbf16> to vector<8x8x32xf32>
    %c0_2 = arith.constant 0 : index
    %c0_3 = arith.constant 0 : index
    %2 = vector.load %arg3[%c0_2, %c0_3] : memref<1x32xf32, #tpu.memory_space<vmem>>, vector<1x32xf32>
    %3 = vector.shape_cast %2 : vector<1x32xf32> to vector<1x1x32xf32>
    %4 = vector.broadcast %3 : vector<1x1x32xf32> to vector<8x8x32xf32>
    %5 = arith.mulf %1, %4 : vector<8x8x32xf32>
    %cst = arith.constant dense<0.000000e+00> : vector<8x8xf32>
    %6 = vector.multi_reduction <add>, %5, %cst [2] : vector<8x8x32xf32> to vector<8x8xf32>
    %cst_4 = arith.constant dense<0xFF800000> : vector<8xf32>
    %7 = vector.multi_reduction <maximumf>, %6, %cst_4 [1] : vector<8x8xf32> to vector<8xf32>
    %8 = vector.shape_cast %7 : vector<8xf32> to vector<8x1xf32>
    %9 = vector.broadcast %8 : vector<8x1xf32> to vector<8x8xf32>
    %10 = arith.subf %6, %9 : vector<8x8xf32>
    %11 = math.exp %10 : vector<8x8xf32>
    %cst_5 = arith.constant dense<0.000000e+00> : vector<8xf32>
    %12 = vector.multi_reduction <add>, %11, %cst_5 [1] : vector<8x8xf32> to vector<8xf32>
    %13 = vector.shape_cast %12 : vector<8xf32> to vector<8x1xf32>
    %14 = tpu.reciprocal %13 {approx = true} : vector<8x1xf32> -> vector<8x1xf32>
    %15 = vector.shape_cast %11 : vector<8x8xf32> to vector<8x8x1xf32>
    %16 = vector.broadcast %15 : vector<8x8x1xf32> to vector<8x8x32xf32>
    %17 = arith.mulf %1, %16 : vector<8x8x32xf32>
    %cst_6 = arith.constant dense<0.000000e+00> : vector<8x32xf32>
    %18 = vector.multi_reduction <add>, %17, %cst_6 [1] : vector<8x8x32xf32> to vector<8x32xf32>
    %19 = vector.broadcast %14 : vector<8x1xf32> to vector<8x32xf32>
    %20 = arith.mulf %18, %19 : vector<8x32xf32>
    %c0_7 = arith.constant 0 : index
    %c0_8 = arith.constant 0 : index
    %21 = vector.load %arg2[%c0_7, %c0_8] : memref<8x32xbf16, #tpu.memory_space<vmem>>, vector<8x32xbf16>
    %22 = arith.extf %21 : vector<8x32xbf16> to vector<8x32xf32>
    %23 = arith.addf %20, %22 : vector<8x32xf32>
    %c0_9 = arith.constant 0 : index
    %c0_10 = arith.constant 0 : index
    %24 = vector.load %arg4[%c0_9, %c0_10] : memref<32x128xf32, #tpu.memory_space<vmem>>, vector<32x128xf32>
    %cst_11 = arith.constant dense<0.000000e+00> : vector<8x128xf32>
    %25 = tpu.matmul %23, %24, %cst_11 {dimension_numbers = #tpu.dot_dimension_numbers<[1], [0], [0], [1], [0, 0, 1, 1], [], []>} : vector<8x32xf32>, vector<32x128xf32>, vector<8x128xf32> -> vector<8x128xf32>
    %c0_12 = arith.constant 0 : index
    %c0_13 = arith.constant 0 : index
    %26 = vector.load %arg5[%c0_12, %c0_13] : memref<1x128xf32, #tpu.memory_space<vmem>>, vector<1x128xf32>
    %27 = vector.broadcast %26 : vector<1x128xf32> to vector<8x128xf32>
    %28 = arith.addf %25, %27 : vector<8x128xf32>
    %c0_14 = arith.constant 0 : index
    %c0_15 = arith.constant 0 : index
    %29 = vector.load %arg6[%c0_14, %c0_15] : memref<8x128xf32, #tpu.memory_space<vmem>>, vector<8x128xf32>
    tpu.vector_store %arg6[%c0_14, %c0_15], %28 {strides = array<i32>} : memref<8x128xf32, #tpu.memory_space<vmem>>, vector<8x128xf32>,
    return
  }
  func.func @transform_0(%arg0: i32) -> (i32, i32, i32) {
    %c0_i32 = arith.constant 0 : i32
    %c0_i32_0 = arith.constant 0 : i32
    %c0_i32_1 = arith.constant 0 : i32
    return %arg0, %c0_i32, %c0_i32_0 : i32, i32, i32
  }
  func.func @transform_1(%arg0: i32) -> (i32, i32) {
    %c0_i32 = arith.constant 0 : i32
    %c0_i32_0 = arith.constant 0 : i32
    return %arg0, %c0_i32 : i32, i32
  }
  func.func @transform_2(%arg0: i32) -> (i32, i32) {
    %c0_i32 = arith.constant 0 : i32
    %c0_i32_0 = arith.constant 0 : i32
    %c0_i32_1 = arith.constant 0 : i32
    return %c0_i32, %c0_i32_0 : i32, i32
  }
  func.func @transform_3(%arg0: i32) -> (i32, i32) {
    %c0_i32 = arith.constant 0 : i32
    %c0_i32_0 = arith.constant 0 : i32
    %c0_i32_1 = arith.constant 0 : i32
    return %c0_i32, %c0_i32_0 : i32, i32
  }
  func.func @transform_4(%arg0: i32) -> (i32, i32) {
    %c0_i32 = arith.constant 0 : i32
    %c0_i32_0 = arith.constant 0 : i32
    %c0_i32_1 = arith.constant 0 : i32
    return %c0_i32, %c0_i32_0 : i32, i32
  }
  func.func @transform_5(%arg0: i32) -> (i32, i32) {
    %c0_i32 = arith.constant 0 : i32
    %c0_i32_0 = arith.constant 0 : i32
    return %arg0, %c0_i32 : i32, i32
  }
}

</mosaic_0001>

<bundles_post_ra>
// kernel: tpu_custom_call.1
= control target key start
LH: loop header
LB: loop body
LE: loop exit
PB: predicated region body
PF: predicated region fallthrough
CT: control target
= control target key end

     0   :  { %10 = vsyncpa [#allocation3], 0  ;;  %s893_s0 = inlined_call_operand.hbm [shape: bf16[8,8,32], index: 0, kind: input, shape index: {}]   ;;  %s894_s1 = inlined_call_operand.hbm [shape: bf16[8,32], index: 1, kind: input, shape index: {}]   ;;  %s895_s2 = inlined_call_operand.vmem [shape: f32[1,32], index: 2, kind: input, shape index: {}]   ;;  %s896_s3 = inlined_call_operand.hbm [shape: f32[32,128], index: 3, kind: input, shape index: {}]   ;;  %s897_s4 = inlined_call_operand.vmem [shape: f32[1,128], index: 4, kind: input, shape index: {}]   ;;  %s898_s5 = inlined_call_operand.hbm [shape: f32[8,128], index: 5, kind: output, shape index: {}]  }
   0x1   :  { %11 = vsyncpa [#allocation6], 0 }
   0x2   :  { %12 = vsyncpa [#allocation4], 0  ;;  %s717_s18 = smov [#allocation5]   ;;  %s718_s20 = smov [#allocation2]  }
   0x3   :  { %s31_s19 = sshll.u32 %s717_s18, 4  ;;  %s18_s21 = sshll.u32 %s718_s20, 4  ;;  %s32_s19 = int_to_ptr.vmem [resolvable:$true] %s31_s19  ;;  %s19_s21 = int_to_ptr.vmem [resolvable:$true] %s18_s21 }
   0x4   :  { %s639_s22 = scalar_lea.vmem %s32_s19, 64  ;;  %p644_p1 = scmp.lt.s32.totalorder %s32_s19, %s32_s19 }
   0x5   :  { %p640_p0 = scmp.ne.s32.totalorder %s32_s19, %s639_s22  ;;  %p645_p2 = scmp.lt.s32.totalorder %s639_s22, %s639_s22 }
   0x7   :  { %p646_p3 = por %p645_p2, %p644_p1 }
   0x9   :  { %p647_p4 = pnand %p646_p3, %p640_p0 }
   0xb   :  { %650 = shalt.err (!%p647_p4)
}
   0xc   :  { %34 = dma.hbm_to_vmem [thread:$0]  %s894_s1, 64, %s32_s19, [#allocation6]  }
   0xd   :  { %s659_s25 = scalar_lea.vmem %s19_s21, 512  ;;  %p664_p6 = scmp.lt.s32.totalorder %s19_s21, %s19_s21 }
   0xe   :  { %p660_p5 = scmp.ne.s32.totalorder %s19_s21, %s659_s25  ;;  %p665_p7 = scmp.lt.s32.totalorder %s659_s25, %s659_s25 }
  0x10   :  { %p666_p8 = por %p665_p7, %p664_p6 }
  0x12   :  { %p667_p9 = pnand %p666_p8, %p660_p5 }
  0x14   :  { %670 = shalt.err (!%p667_p9)
}
  0x15   :  { %s719_s26 = smov 64   ;;  %s720_s27 = smov 4  }
  0x16   :  { %24 = dma.hbm_to_vmem [thread:$0]  %s893_s0, 512, %s19_s21, [#allocation3], %s719_s26, %s719_s26, %s720_s27  }
  0x17   :  { %s721_s30 = smov [#allocation7]  }
  0x18   :  { %s42_s6 = sshll.u32 %s721_s30, 4  ;;  %s43_s6 = int_to_ptr.vmem [resolvable:$true] %s42_s6 }
  0x19   :  { %s679_s7 = scalar_lea.vmem %s43_s6, 512  ;;  %p684_p11 = scmp.lt.s32.totalorder %s43_s6, %s43_s6 }
  0x1a   :  { %p680_p10 = scmp.ne.s32.totalorder %s43_s6, %s679_s7  ;;  %p685_p12 = scmp.lt.s32.totalorder %s679_s7, %s679_s7 }
  0x1c   :  { %p686_p13 = por %p685_p12, %p684_p11 }
  0x1e   :  { %p687_p0 = pnand %p686_p13, %p680_p10 }
  0x20   :  { %690 = shalt.err (!%p687_p0)
}
  0x21   :  { %s722_s1 = smov 128   ;;  %s723_s8 = smov 8  }
  0x22   :  { %48 = dma.hbm_to_vmem [thread:$0]  %s896_s3, 512, %s43_s6, [#allocation6], %s722_s1, %s722_s1, %s723_s8  }
  0x23   :  { %711 = dma.done.wait [#allocation3], 512  }
  0x24   :  { %712 = vsyncadd [#allocation3], 4294966784 }
  0x25   :  { %713 = dma.done.wait [#allocation6], 576  }
  0x26   :  { %714 = vsyncadd [#allocation6], 4294966720  ;;  %v767_v0 = vld [vmem:[#allocation2] sm:$0xff]   ;;  %v772_v2 = vld [vmem:[#allocation2 + $0x8] sm:$0xff]   ;;  %vm91_vm0 = vcmask 261120   ;;  %v124_v29 = vlaneseq  ;;  %vm158_vm1 = vcmask 1041409  }
  0x27   :  { %v562_v1 = vld [vmem:[%s895_s2] ss:$0 sm:$0xff]  ;;  %v567_v3 = vunpack.c.l.bf16 %v767_v0  ;;  %v571_v4 = vunpack.c.l.bf16 %v772_v2  ;;  %v568_v5 = vunpack.c.h.bf16 %v767_v0  ;;  %v572_v6 = vunpack.c.h.bf16 %v772_v2  ;;  %v778_v7 = vld [vmem:[#allocation2 + $0x10] sm:$0xff]   ;;  %v790_v14 = vld [vmem:[#allocation2 + $0x18] sm:$0xff]   ;;  %s727_s12 = smov [#allocation8]  }
  0x28   :  { %v575_v8 = vunpack.c.l.bf16 %v778_v7  ;;  %v576_v9 = vunpack.c.h.bf16 %v778_v7  ;;  %v579_v17 = vunpack.c.l.bf16 %v790_v14  ;;  %v580_v18 = vunpack.c.h.bf16 %v790_v14  ;;  %s552_s13 = sshll.u32 %s727_s12, 4  ;;  %s553_s13 = int_to_ptr.vmem [resolvable:$true] %s552_s13 }
  0x29   :  { %v83_v10 = vmul.f32 %v567_v3, %v562_v1  ;;  %v85_v11 = vmul.f32 %v571_v4, %v562_v1  ;;  %v84_v12 = vmul.f32 %v568_v5, %v562_v1  ;;  %v86_v13 = vmul.f32 %v572_v6, %v562_v1  ;;  %s691_s14 = scalar_lea.vmem %s553_s13, 128  ;;  %p696_p2 = scmp.lt.s32.totalorder %s553_s13, %s553_s13 }
  0x2a   :  { %v87_v21 = vmul.f32 %v575_v8, %v562_v1  ;;  %v88_v22 = vmul.f32 %v576_v9, %v562_v1  ;;  %v89_v25 = vmul.f32 %v579_v17, %v562_v1  ;;  %v90_v26 = vmul.f32 %v580_v18, %v562_v1  ;;  %p692_p1 = scmp.ne.s32.totalorder %s553_s13, %s691_s14  ;;  %p697_p3 = scmp.lt.s32.totalorder %s691_s14, %s691_s14 }
  0x2b   :  { %v92_v15 = vsel %vm91_vm0, %v83_v10, 0.0  ;;  %v98_v16 = vsel %vm91_vm0, %v85_v11, 0.0  ;;  %v95_v19 = vsel %vm91_vm0, %v84_v12, 0.0  ;;  %v101_v20 = vsel %vm91_vm0, %v86_v13, 0.0 }
  0x2c   :  { %93 = vadd.xlane.f32.xlu0 %v92_v15  ;;  %99 = vadd.xlane.f32.xlu1 %v98_v16  ;;  %v104_v23 = vsel %vm91_vm0, %v87_v21, 0.0  ;;  %v107_v24 = vsel %vm91_vm0, %v88_v22, 0.0  ;;  %v110_v27 = vsel %vm91_vm0, %v89_v25, 0.0  ;;  %v113_v28 = vsel %vm91_vm0, %v90_v26, 0.0  ;;  %p698_p4 = por %p697_p3, %p696_p2 }
  0x2d   :  { %v125_v30 = vand.u32 127, %v124_v29  ;;  %v810_v31 = vshrl.u32 %v124_v29, 7  ;;  %vm160_vm2 = vcmask 1042434   ;;  %vm162_vm3 = vcmask 1043459  }
  0x2e   :  { %vm164_vm4 = vcmask 1044484   ;;  %vm166_vm5 = vcmask 1045509   ;;  %vm168_vm6 = vcmask 1046534   ;;  %vm170_vm7 = vcmask 1047559   ;;  %p699_p5 = pnand %p698_p4, %p692_p1 }
  0x2f   :  { %v813_v34 = vsub.s32 %v125_v30, %v810_v31  ;;  %vm173_vm8 = vcmask 64512   ;;  %v724_v57 = vmov 0   ;;  %v180_v58 = vsub.s32 0, %v810_v31 }
  0x30   :  { %96 = vadd.xlane.f32.xlu0 %v95_v19  ;;  %102 = vadd.xlane.f32.xlu1 %v101_v20  ;;  %v184_v59 = vsub.s32 1, %v810_v31  ;;  %v188_v60 = vsub.s32 2, %v810_v31  ;;  %v192_v61 = vsub.s32 3, %v810_v31  ;;  %v196_v11 = vsub.s32 4, %v810_v31 }
  0x31   :  { %612 = vset.pattern.permute.xlu0 %v724_v57  ;;  %611 = vset.pattern.permute.xlu1 %v724_v57  ;;  %v200_v21 = vsub.s32 5, %v810_v31  ;;  %v204_v25 = vsub.s32 6, %v810_v31  ;;  %v208_v29 = vsub.s32 7, %v810_v31  ;;  %vm726_vm9 = vmmov 0  }
  0x34   :  { %105 = vadd.xlane.f32.xlu0 %v104_v23  ;;  %108 = vadd.xlane.f32.xlu1 %v107_v24 }
  0x38   :  { %111 = vadd.xlane.f32.xlu0 %v110_v27  ;;  %114 = vadd.xlane.f32.xlu1 %v113_v28 }
  0xb5   :  { %v94_v32 = vpop.xlane.xlu0 %93  ;;  %v100_v33 = vpop.xlane.xlu1 %99 }
  0xb6   :  { %v129_v37 = vrot.slane %v94_v32, %v813_v34  ;;  %v137_v40 = vrot.slane %v100_v33, %v813_v34 }
  0xb9   :  { %v97_v35 = vpop.xlane.xlu0 %96  ;;  %v103_v36 = vpop.xlane.xlu1 %102 }
  0xba   :  { %v133_v38 = vrot.slane %v97_v35, %v813_v34  ;;  %v141_v39 = vrot.slane %v103_v36, %v813_v34 }
  0xbc   :  { %v159_v41 = vsel %vm158_vm1, %v133_v38, %v129_v37 }
  0xbd   :  { %v161_v42 = vsel %vm160_vm2, %v137_v40, %v159_v41  ;;  %v106_v43 = vpop.xlane.xlu0 %105  ;;  %v109_v44 = vpop.xlane.xlu1 %108 }
  0xbe   :  { %v163_v45 = vsel %vm162_vm3, %v141_v39, %v161_v42  ;;  %v145_v46 = vrot.slane %v106_v43, %v813_v34  ;;  %v149_v47 = vrot.slane %v109_v44, %v813_v34 }
  0xc0   :  { %v165_v48 = vsel %vm164_vm4, %v145_v46, %v163_v45 }
  0xc1   :  { %v112_v49 = vpop.xlane.xlu0 %111  ;;  %v115_v50 = vpop.xlane.xlu1 %114  ;;  %v167_v53 = vsel %vm166_vm5, %v149_v47, %v165_v48 }
  0xc2   :  { %v153_v51 = vrot.slane %v112_v49, %v813_v34  ;;  %v157_v52 = vrot.slane %v115_v50, %v813_v34 }
  0xc4   :  { %v169_v54 = vsel %vm168_vm6, %v153_v51, %v167_v53 }
  0xc5   :  { %v171_v55 = vsel %vm170_vm7, %v157_v52, %v169_v54 }
  0xc6   :  { %v174_v56 = vsel %vm173_vm8, %v171_v55, -inf }
  0xc7   :  { %175 = vmax.xlane.f32.xlu0 %v174_v56 }
 0x150   :  { %v176_v62 = vpop.xlane.xlu0 %175 }
 0x151   :  { %v181_v63 = vrot.slane %v176_v62, %v180_v58  ;;  %v185_v1 = vrot.slane %v176_v62, %v184_v59  ;;  %v189_v10 = vrot.slane %v176_v62, %v188_v60  ;;  %v193_v12 = vrot.slane %v176_v62, %v192_v61 }
 0x152   :  { %v197_v22 = vrot.slane %v176_v62, %v196_v11  ;;  %v201_v26 = vrot.slane %v176_v62, %v200_v21  ;;  %v205_v30 = vrot.slane %v176_v62, %v204_v25  ;;  %v725_v21 = vmov 0.0  }
 0x153   :  { %v218_v13 = vsub.f32 %v94_v32, %v181_v63  ;;  %v219_v15 = vsub.f32 %v97_v35, %v185_v1  ;;  %v220_v16 = vsub.f32 %v100_v33, %v189_v10  ;;  %v221_v23 = vsub.f32 %v103_v36, %v193_v12  ;;  %589 = vmatprep.subr.mxu0 %v725_v21 }
 0x154   :  { %v222_v27 = vsub.f32 %v106_v43, %v197_v22  ;;  %v223_v32 = vsub.f32 %v109_v44, %v201_v26  ;;  %v209_v35 = vrot.slane %v176_v62, %v208_v29  ;;  %v224_v37 = vsub.f32 %v112_v49, %v205_v30  ;;  %v442_v22 = vld [vmem:[#allocation7 + $0x10] sm:$0xff]  ;;  %597 = vmatprep.mubr.msk.f32.mxu0 %vm726_vm9, %v725_v21 }
 0x155   :  { %v226_v19 = vmul.f32 1.442695, %v218_v13  ;;  %v228_v20 = vmul.f32 1.442695, %v219_v15  ;;  %v230_v24 = vmul.f32 1.442695, %v220_v16 }
 0x156   :  { %v232_v28 = vmul.f32 1.442695, %v221_v23  ;;  %v234_v33 = vmul.f32 1.442695, %v222_v27  ;;  %v236_v38 = vmul.f32 1.442695, %v223_v32  ;;  %v225_v40 = vsub.f32 %v115_v50, %v209_v35 }
 0x157   :  { %613 = vpow2.f32 %v226_v19  ;;  %v238_v41 = vmul.f32 1.442695, %v224_v37  ;;  %v441_v23 = vld [vmem:[#allocation7 + $0x8] sm:$0xff] }
 0x158   :  { %615 = vpow2.f32 %v228_v20  ;;  %v240_v43 = vmul.f32 1.442695, %v225_v40  ;;  %v443_v20 = vld [vmem:[#allocation7 + $0x18] sm:$0xff] }
 0x159   :  { %617 = vpow2.f32 %v230_v24  ;;  %590 = vmatpush3.msra.mxu0 %v443_v20 }
 0x15a   :  { %619 = vpow2.f32 %v232_v28  ;;  %591 = vmatprep.subr.mxu0 %v725_v21 }
 0x15b   :  { %621 = vpow2.f32 %v234_v33  ;;  %592 = vmatpush3.msra.mxu0 %v442_v22 }
 0x15c   :  { %623 = vpow2.f32 %v236_v38  ;;  %593 = vmatprep.subr.mxu0 %v725_v21 }
 0x15d   :  { %625 = vpow2.f32 %v238_v41  ;;  %594 = vmatpush3.msra.mxu0 %v441_v23 }
 0x15e   :  { %627 = vpow2.f32 %v240_v43  ;;  %595 = vmatprep.subr.mxu0 %v725_v21 }
 0x164   :  { %v614_v36 = vpop.eup %613 }
 0x165   :  { %v616_v39 = vpop.eup %615  ;;  %251 = vperm.xlu1 %611, %v614_v36  }
 0x166   :  { %254 = vperm.xlu0 %612, %v616_v39   ;;  %v618_v42 = vpop.eup %617 }
 0x167   :  { %v620_v31 = vpop.eup %619 }
 0x168   :  { %v622_v44 = vpop.eup %621 }
 0x169   :  { %257 = vperm.xlu1 %611, %v618_v42   ;;  %v624_v45 = vpop.eup %623 }
 0x16a   :  { %v626_v46 = vpop.eup %625 }
 0x16b   :  { %v628_v47 = vpop.eup %627 }
 0x16d   :  { %260 = vperm.xlu1 %611, %v620_v31  }
 0x171   :  { %263 = vperm.xlu1 %611, %v622_v44  }
 0x175   :  { %266 = vperm.xlu1 %611, %v624_v45  }
 0x179   :  { %269 = vperm.xlu1 %611, %v626_v46  }
 0x17d   :  { %272 = vperm.xlu1 %611, %v628_v47  }
 0x1e0   :  { %v252_v48 = vpop.permute.xlu1 %251 }
 0x1e1   :  { %v255_v52 = vpop.permute.xlu0 %254  ;;  %v277_v55 = vrot.slane %v252_v48, %v813_v34  ;;  %v326_v24 = vmul.f32 %v567_v3, %v252_v48 }
 0x1e2   :  { %v281_v54 = vrot.slane %v255_v52, %v813_v34  ;;  %v327_v25 = vmul.f32 %v568_v5, %v255_v52 }
 0x1e3   :  { %v334_v0 = vsel %vm91_vm0, %v326_v24, 0.0 }
 0x1e4   :  { %v258_v49 = vpop.permute.xlu1 %257  ;;  %v306_v60 = vsel %vm158_vm1, %v281_v54, %v277_v55  ;;  %v341_v5 = vsel %vm91_vm0, %v327_v25, 0.0 }
 0x1e5   :  { %v285_v56 = vrot.slane %v258_v49, %v813_v34  ;;  %v328_v26 = vmul.f32 %v571_v4, %v258_v49  ;;  %v342_v32 = vrot.slane %v341_v5, 4 }
 0x1e7   :  { %v307_v62 = vsel %vm160_vm2, %v285_v56, %v306_v60  ;;  %v348_v4 = vsel %vm91_vm0, %v328_v26, 0.0  ;;  %v343_v39 = vadd.f32 %v342_v32, %v341_v5 }
 0x1e8   :  { %v261_v50 = vpop.permute.xlu1 %260  ;;  %v349_v14 = vrot.slane %v348_v4, 4 }
 0x1e9   :  { %v289_v57 = vrot.slane %v261_v50, %v813_v34  ;;  %v329_v27 = vmul.f32 %v572_v6, %v261_v50  ;;  %v344_v46 = vrot.slane %v343_v39, 2 }
 0x1ea   :  { %v350_v40 = vadd.f32 %v349_v14, %v348_v4 }
 0x1eb   :  { %v308_v1 = vsel %vm162_vm3, %v289_v57, %v307_v62  ;;  %v355_v2 = vsel %vm91_vm0, %v329_v27, 0.0  ;;  %v345_v55 = vadd.f32 %v344_v46, %v343_v39  ;;  %v414_v62 = vld [vmem:[#allocation5] sm:$0xf] }
 0x1ec   :  { %v264_v51 = vpop.permute.xlu1 %263  ;;  %v351_v47 = vrot.slane %v350_v40, 2 }
 0x1ed   :  { %v293_v58 = vrot.slane %v264_v51, %v813_v34  ;;  %v330_v28 = vmul.f32 %v575_v8, %v264_v51 }
 0x1ee   :  { %v352_v56 = vadd.f32 %v351_v47, %v350_v40 }
 0x1ef   :  { %v309_v10 = vsel %vm164_vm4, %v293_v58, %v308_v1  ;;  %v362_v6 = vsel %vm91_vm0, %v330_v28, 0.0  ;;  %v346_v1 = vrot.slane %v345_v55, 1 }
 0x1f0   :  { %v267_v53 = vpop.permute.xlu1 %266  ;;  %v363_v33 = vrot.slane %v362_v6, 4 }
 0x1f1   :  { %v297_v61 = vrot.slane %v267_v53, %v813_v34  ;;  %v331_v29 = vmul.f32 %v576_v9, %v267_v53  ;;  %v347_v21 = vadd.f32 %v346_v1, %v345_v55 }
 0x1f2   :  { %v364_v42 = vadd.f32 %v363_v33, %v362_v6 }
 0x1f3   :  { %v310_v13 = vsel %vm166_vm5, %v297_v61, %v309_v10  ;;  %v369_v8 = vsel %vm91_vm0, %v331_v29, 0.0  ;;  %v353_v10 = vrot.slane %v352_v56, 1 }
 0x1f4   :  { %v270_v59 = vpop.permute.xlu1 %269  ;;  %v370_v35 = vrot.slane %v369_v8, 4  ;;  %v365_v49 = vrot.slane %v364_v42, 2 }
 0x1f5   :  { %v301_v63 = vrot.slane %v270_v59, %v813_v34  ;;  %v332_v30 = vmul.f32 %v579_v17, %v270_v59  ;;  %v335_v17 = vrot.slane %v334_v0, 4  ;;  %v354_v22 = vadd.f32 %v353_v10, %v352_v56 }
 0x1f6   :  { %v371_v43 = vadd.f32 %v370_v35, %v369_v8  ;;  %v366_v58 = vadd.f32 %v365_v49, %v364_v42 }
 0x1f7   :  { %v311_v15 = vsel %vm168_vm6, %v301_v63, %v310_v13  ;;  %v376_v7 = vsel %vm91_vm0, %v332_v30, 0.0  ;;  %v336_v36 = vadd.f32 %v335_v17, %v334_v0 }
 0x1f8   :  { %v273_v11 = vpop.permute.xlu1 %272  ;;  %v377_v37 = vrot.slane %v376_v7, 4  ;;  %v372_v51 = vrot.slane %v371_v43, 2 }
 0x1f9   :  { %v305_v12 = vrot.slane %v273_v11, %v813_v34  ;;  %v440_v34 = vld [vmem:[#allocation7] sm:$0xff]  ;;  %v333_v3 = vmul.f32 %v580_v18, %v273_v11  ;;  %v356_v18 = vrot.slane %v355_v2, 4  ;;  %v337_v45 = vrot.slane %v336_v36, 2 }
 0x1fa   :  { %596 = vmatpush3.msra.mxu0 %v440_v34  ;;  %v378_v31 = vadd.f32 %v377_v37, %v376_v7  ;;  %v373_v59 = vadd.f32 %v372_v51, %v371_v43 }
 0x1fb   :  { %v312_v16 = vsel %vm170_vm7, %v305_v12, %v311_v15  ;;  %v383_v9 = vsel %vm91_vm0, %v333_v3, 0.0  ;;  %v357_v41 = vadd.f32 %v356_v18, %v355_v2  ;;  %v338_v54 = vadd.f32 %v337_v45, %v336_v36 }
 0x1fc   :  { %v314_v19 = vsel %vm173_vm8, %v312_v16, 0.0  ;;  %v384_v38 = vrot.slane %v383_v9, 4  ;;  %v379_v52 = vrot.slane %v378_v31, 2  ;;  %v367_v12 = vrot.slane %v366_v58, 1 }
 0x1fd   :  { %315 = vadd.xlane.f32.xlu1 %v314_v19  ;;  %v358_v48 = vrot.slane %v357_v41, 2  ;;  %v339_v63 = vrot.slane %v338_v54, 1  ;;  %v374_v13 = vrot.slane %v373_v59, 1  ;;  %v415_v19 = vunpack.c.l.bf16 %v414_v62 }
 0x1fe   :  { %v385_v44 = vadd.f32 %v384_v38, %v383_v9  ;;  %v380_v60 = vadd.f32 %v379_v52, %v378_v31  ;;  %v368_v34 = vadd.f32 %v367_v12, %v366_v58 }
 0x1ff   :  { %v359_v57 = vadd.f32 %v358_v48, %v357_v41  ;;  %v340_v20 = vadd.f32 %v339_v63, %v338_v54  ;;  %v375_v24 = vadd.f32 %v374_v13, %v373_v59  ;;  %v417_v27 = vrot.slane %v415_v19, 1 }
 0x200   :  { %v386_v53 = vrot.slane %v385_v44, 2  ;;  %v381_v15 = vrot.slane %v380_v60, 1  ;;  %v418_v29 = vrot.slane %v415_v19, 2  ;;  %v419_v30 = vrot.slane %v415_v19, 3 }
 0x201   :  { %v360_v11 = vrot.slane %v359_v57, 1  ;;  %v420_v3 = vrot.slane %v415_v19, 4  ;;  %v421_v0 = vrot.slane %v415_v19, 5  ;;  %v422_v38 = vrot.slane %v415_v19, 6 }
 0x202   :  { %v387_v61 = vadd.f32 %v386_v53, %v385_v44  ;;  %v382_v25 = vadd.f32 %v381_v15, %v380_v60  ;;  %v423_v36 = vrot.slane %v415_v19, 7 }
 0x203   :  { %v361_v23 = vadd.f32 %v360_v11, %v359_v57 }
 0x204   :  { %v388_v16 = vrot.slane %v387_v61, 1 }
 0x206   :  { %v389_v26 = vadd.f32 %v388_v16, %v387_v61  ;;  %v563_v61 = vld [vmem:[%s897_s4] ss:$0 sm:$0xff] }
 0x286   :  { %v316_v50 = vpop.xlane.xlu1 %315 }
 0x287   :  { %629 = vrcp.f32 %v316_v50 }
 0x294   :  { %v630_v28 = vpop.eup %629 }
 0x295   :  { %v391_v5 = vrot.slane %v630_v28, 1  ;;  %v392_v4 = vrot.slane %v630_v28, 2  ;;  %v393_v2 = vrot.slane %v630_v28, 3  ;;  %v394_v6 = vrot.slane %v630_v28, 4 }
 0x296   :  { %v395_v8 = vrot.slane %v630_v28, 5  ;;  %v396_v7 = vrot.slane %v630_v28, 6  ;;  %v397_v9 = vrot.slane %v630_v28, 7  ;;  %v406_v17 = vmul.f32 %v630_v28, %v340_v20 }
 0x297   :  { %v407_v32 = vmul.f32 %v391_v5, %v347_v21  ;;  %v408_v14 = vmul.f32 %v392_v4, %v354_v22  ;;  %v409_v18 = vmul.f32 %v393_v2, %v361_v23  ;;  %v410_v33 = vmul.f32 %v394_v6, %v368_v34 }
 0x298   :  { %v411_v35 = vmul.f32 %v395_v8, %v375_v24  ;;  %v412_v37 = vmul.f32 %v396_v7, %v382_v25  ;;  %v413_v39 = vmul.f32 %v397_v9, %v389_v26  ;;  %v432_v31 = vadd.f32 %v415_v19, %v406_v17 }
 0x299   :  { %v433_v40 = vadd.f32 %v417_v27, %v407_v32  ;;  %v434_v41 = vadd.f32 %v418_v29, %v408_v14  ;;  %v435_v42 = vadd.f32 %v419_v30, %v409_v18  ;;  %v436_v43 = vadd.f32 %v420_v3, %v410_v33 }
 0x29a   :  { %v437_v44 = vadd.f32 %v421_v0, %v411_v35  ;;  %v438_v47 = vadd.f32 %v422_v38, %v412_v37  ;;  %v439_v48 = vadd.f32 %v423_v36, %v413_v39 }
 0x29b   :  { %v459_v45 = vrot.slane %v433_v40, 7  ;;  %v461_v46 = vrot.slane %v434_v41, 6  ;;  %v463_v50 = vrot.slane %v435_v42, 5  ;;  %v465_v52 = vrot.slane %v436_v43, 4 }
 0x29c   :  { %v467_v54 = vrot.slane %v437_v44, 3  ;;  %v469_v56 = vrot.slane %v438_v47, 2  ;;  %v471_v58 = vrot.slane %v439_v48, 1 }
 0x29d   :  { %v460_v49 = vsel %vm158_vm1, %v459_v45, %v432_v31 }
 0x29e   :  { %v462_v51 = vsel %vm160_vm2, %v461_v46, %v460_v49 }
 0x29f   :  { %v464_v53 = vsel %vm162_vm3, %v463_v50, %v462_v51 }
 0x2a0   :  { %v466_v55 = vsel %vm164_vm4, %v465_v52, %v464_v53 }
 0x2a1   :  { %v468_v57 = vsel %vm166_vm5, %v467_v54, %v466_v55 }
 0x2a2   :  { %v470_v59 = vsel %vm168_vm6, %v469_v56, %v468_v57 }
 0x2a3   :  { %v472_v60 = vsel %vm170_vm7, %v471_v58, %v470_v59 }
 0x2a4   :  { %598 = vmatmul.mubr.msk.f32.vlgmr.msra.gmra.mxu0 %vm91_vm0, %v472_v60 }
 0x364   :  { %v541_v62 = vpop.f32.mrf.mxu0 }
 0x365   :  { %v542_v63 = vadd.f32 %v563_v61, %v541_v62 }
 0x366   :  { %v599_v1 = vpop.f32.mrf.mxu0 }
 0x367   :  { %545 = vst [vmem:[#allocation8] sm:$0xff] %v542_v63 }
 0x368   :  { %702 = shalt.err (!%p699_p5)
}
 0x369   :  { %555 = dma.vmem_to_hbm [thread:$0]  %s553_s13, 128, %s898_s5, [#allocation4]  }
 0x36a   :  { %715 = dma.done.wait [#allocation4], 128  }
 0x36b   :  { %716 = vsyncadd [#allocation4], 4294967168 }
 0x36c   :  { %559 = vsyncpa [#allocation3], 1 }
 0x36d   :  { %560 = vsyncpa [#allocation6], 1 }
 0x36e   :  { %561 = vsyncpa [#allocation4], 1 }

</bundles_post_ra>
